<compile_context>
chip_gen: v5e
topology: v5e:2x2
jax: 0.10.0
libtpu: 0.0.40
codegen_flags: <defaults>
</compile_context>

<pallas_src>
import functools

import jax
import jax.numpy as jnp
from jax.experimental import pallas as pl
from jax.experimental.pallas import tpu as pltpu


def _rmsnorm_kernel(x_ref, o_ref, *, d, eps):
    # x_ref / o_ref: (row_tile, d) VMEM tiles
    xf = x_ref[...].astype(jnp.float32)
    sumsq = jnp.sum(xf * xf, axis=-1, keepdims=True)        # (row_tile, 1) f32
    rms = jnp.sqrt(sumsq) * (float(d) ** -0.5)
    # Per-row reciprocal (exact) + cheap per-element multiply instead of a
    # broadcast divide.  NOTE: eps is added to rms (PyTorch SimpleRMSNorm
    # convention), not inside the sqrt.
    inv = pl.reciprocal(rms + jnp.float32(eps), approx=False)
    o_ref[...] = (xf * inv).astype(o_ref.dtype)


def _sublane_multiple(itemsize):
    # Native sublane packing: (8,128) for 4-byte, (16,128) for 2-byte, (32,128) for 1-byte.
    return {4: 8, 2: 16, 1: 32}.get(itemsize, 8)


def _pick_row_tile(rows, d, itemsize):
    sub = _sublane_multiple(itemsize)
    # Target ~2 MiB of input per block: big enough to amortize the ~0.35 us
    # per-grid-step overhead, small enough that double-buffered in+out blocks
    # plus f32 temporaries fit comfortably in VMEM on every chip (incl. v7x's
    # 64 MiB physical VMEM).
    target_bytes = 2 << 20
    rt = (target_bytes // max(1, d * itemsize)) // sub * sub
    rt = max(sub, rt)
    # Keep the grid long enough (>= ~8 steps) so v7x can shard across both TCs.
    if rows >= 8 * sub:
        rt = min(rt, max(sub, (rows // 8) // sub * sub))
    # Never larger than the (sublane-rounded) row count.
    rt = min(rt, pl.cdiv(rows, sub) * sub)
    return rt


def simple_rms_norm(x, eps=1e-6, row_tile=None):
    """Apply SimpleRMSNorm over the last axis of x using a Pallas TPU kernel."""
    orig_shape = x.shape
    d = orig_shape[-1]
    x2 = x.reshape(-1, d)                          # (rows, d) -- metadata-only reshape
    rows = x2.shape[0]
    itemsize = jnp.dtype(x.dtype).itemsize

    if row_tile is None:
        row_tile = _pick_row_tile(rows, d, itemsize)

    grid = (pl.cdiv(rows, row_tile),)              # partial tail block handled by Pallas

    cost = pl.CostEstimate(
        flops=3 * rows * d,                        # square + sum + scale (roughly)
        transcendentals=rows,                      # one sqrt + reciprocal per row
        bytes_accessed=2 * rows * d * itemsize,    # read + write
    )

    out = pl.pallas_call(
        functools.partial(_rmsnorm_kernel, d=d, eps=eps),
        out_shape=jax.ShapeDtypeStruct((rows, d), x.dtype),
        grid_spec=pltpu.PrefetchScalarGridSpec(
            num_scalar_prefetch=0,
            grid=grid,
            in_specs=[pl.BlockSpec((row_tile, d), lambda i: (i, 0))],
            out_specs=pl.BlockSpec((row_tile, d), lambda i: (i, 0)),
        ),
        compiler_params=pltpu.CompilerParams(
            dimension_semantics=("parallel",),
            vmem_limit_bytes=48 * 1024 * 1024,
        ),
        cost_estimate=cost,
    )(x2)

    return out.reshape(orig_shape)


def _reference(x, eps=1e-6):
    d = x.shape[-1]
    xf = x.astype(jnp.float32)
    norm_x = jnp.linalg.norm(xf, axis=-1, keepdims=True)
    rms_x = norm_x * (d ** -0.5)
    return (xf / (rms_x + eps)).astype(x.dtype)


if __name__ == "__main__":
    key = jax.random.PRNGKey(0)

    # Small shape consistent with the module: (batch=2, seq=8, hidden=32), f32.
    x = jax.random.normal(key, (2, 8, 32), dtype=jnp.float32)
    out = jax.block_until_ready(simple_rms_norm(x, eps=1e-6))
    ref = _reference(x, eps=1e-6)
    assert out.shape == x.shape
    assert jnp.allclose(out, ref, atol=1e-5, rtol=1e-5), (
        float(jnp.max(jnp.abs(out - ref))))

    # Rows not divisible by the row tile (exercises the masked tail block).
    x2 = jax.random.normal(jax.random.PRNGKey(1), (3, 5, 32), dtype=jnp.float32)
    out2 = jax.block_until_ready(simple_rms_norm(x2, eps=1e-6))
    ref2 = _reference(x2, eps=1e-6)
    assert out2.shape == x2.shape
    assert jnp.allclose(out2, ref2, atol=1e-5, rtol=1e-5), (
        float(jnp.max(jnp.abs(out2 - ref2))))

    # bf16 input (dtype-aware sublane tiling; f32 accumulation inside kernel).
    x3 = jax.random.normal(jax.random.PRNGKey(2), (2, 8, 32), dtype=jnp.bfloat16)
    out3 = jax.block_until_ready(simple_rms_norm(x3, eps=1e-6))
    ref3 = _reference(x3, eps=1e-6)
    assert out3.shape == x3.shape
    assert jnp.allclose(out3.astype(jnp.float32), ref3.astype(jnp.float32),
                        atol=2e-2, rtol=2e-2), (
        float(jnp.max(jnp.abs(out3.astype(jnp.float32) - ref3.astype(jnp.float32)))))

    print("KERNEL_OK")
</pallas_src>

<mosaic_0001>
module attributes {stable_mosaic.version = 11 : i64} {
  func.func @_rmsnorm_kernel(%arg0: i32, %arg1: memref<16x32xf32, #tpu.memory_space<vmem>>, %arg2: memref<16x32xf32, #tpu.memory_space<vmem>>) attributes {dimension_semantics = [#tpu.dimension_semantics<parallel>], iteration_bounds = array<i64: 1>, scalar_prefetch = 0 : i64, scratch_operands = 0 : i64, tpu.core_type = #tpu.core_type<tc>, window_params = [{transform_indices = @transform_0, window_bounds = array<i64: 16, 32>}, {transform_indices = @transform_1, window_bounds = array<i64: 16, 32>}]} {
    %c0 = arith.constant 0 : index
    %c0_0 = arith.constant 0 : index
    %0 = vector.load %arg1[%c0, %c0_0] : memref<16x32xf32, #tpu.memory_space<vmem>>, vector<16x32xf32>
    %1 = arith.mulf %0, %0 : vector<16x32xf32>
    %cst = arith.constant dense<0.000000e+00> : vector<16xf32>
    %2 = vector.multi_reduction <add>, %1, %cst [1] : vector<16x32xf32> to vector<16xf32>
    %3 = vector.shape_cast %2 : vector<16xf32> to vector<16x1xf32>
    %4 = math.sqrt %3 : vector<16x1xf32>
    %cst_1 = arith.constant 0.176776692 : f32
    %5 = vector.broadcast %cst_1 : f32 to vector<16x1xf32>
    %6 = arith.mulf %4, %5 : vector<16x1xf32>
    %cst_2 = arith.constant 9.99999997E-7 : f32
    %7 = vector.broadcast %cst_2 : f32 to vector<16x1xf32>
    %8 = arith.addf %6, %7 : vector<16x1xf32>
    %9 = tpu.reciprocal %8 : vector<16x1xf32> -> vector<16x1xf32>
    %10 = vector.broadcast %9 : vector<16x1xf32> to vector<16x32xf32>
    %11 = arith.mulf %0, %10 : vector<16x32xf32>
    %c0_3 = arith.constant 0 : index
    %c0_4 = arith.constant 0 : index
    %12 = vector.load %arg2[%c0_3, %c0_4] : memref<16x32xf32, #tpu.memory_space<vmem>>, vector<16x32xf32>
    tpu.vector_store %arg2[%c0_3, %c0_4], %11 {strides = array<i32>} : memref<16x32xf32, #tpu.memory_space<vmem>>, vector<16x32xf32>,
    return
  }
  func.func @transform_0(%arg0: i32) -> (i32, i32) {
    %c0_i32 = arith.constant 0 : i32
    %c0_i32_0 = arith.constant 0 : i32
    return %arg0, %c0_i32 : i32, i32
  }
  func.func @transform_1(%arg0: i32) -> (i32, i32) {
    %c0_i32 = arith.constant 0 : i32
    %c0_i32_0 = arith.constant 0 : i32
    return %arg0, %c0_i32 : i32, i32
  }
}

</mosaic_0001>

<bundles_post_ra>
// kernel: tpu_custom_call.1
= control target key start
LH: loop header
LB: loop body
LE: loop exit
PB: predicated region body
PF: predicated region fallthrough
CT: control target
= control target key end

     0   :  { %6 = vsyncpa [#allocation3], 0  ;;  %s214_s0 = inlined_call_operand.hbm [shape: f32[16,32], index: 0, kind: input, shape index: {}]   ;;  %s215_s1 = inlined_call_operand.hbm [shape: f32[16,32], index: 1, kind: output, shape index: {}]  }
   0x1   :  { %7 = vsyncpa [#allocation4], 0  ;;  %s12_s8 = sshll.u32 %s214_s0, 4  ;;  %s179_s9 = smov [#allocation2]   ;;  %s13_s8 = int_to_ptr.hbm [resolvable:$true] %s12_s8 }
   0x2   :  { %s14_s10 = sshll.u32 %s179_s9, 4  ;;  %s180_s11 = smov 128   ;;  %s15_s10 = int_to_ptr.vmem [resolvable:$true] %s14_s10 }
   0x3   :  { %s181_s12 = smov 8  }
   0x4   :  { %20 = dma.hbm_to_vmem [thread:$0]  %s13_s8, 256, %s15_s10, [#allocation3], %s180_s11, %s180_s11, %s181_s12  }
   0x5   :  { %175 = dma.done.wait [#allocation3], 256  }
   0x6   :  { %176 = vsyncadd [#allocation3], 4294967040  ;;  %v25_v0 = vld [vmem:[#allocation2] sm:$0xff]  ;;  %vm29_vm0 = vcmask 261120   ;;  %v199_v2 = vld [vmem:[#allocation2 + $0x8] sm:$0xff]  ;;  %s182_s0 = smov [#allocation5]  }
   0x7   :  { %v27_v1 = vmul.f32 %v25_v0, %v25_v0  ;;  %v28_v4 = vmul.f32 %v199_v2, %v199_v2  ;;  %s100_s13 = sshll.u32 %s182_s0, 4  ;;  %s102_s16 = sshll.u32 %s215_s1, 4  ;;  %s101_s13 = int_to_ptr.vmem [resolvable:$true] %s100_s13  ;;  %s103_s16 = int_to_ptr.hbm [resolvable:$true] %s102_s16 }
   0x9   :  { %v30_v3 = vsel %vm29_vm0, %v27_v1, 0.0  ;;  %v33_v5 = vsel %vm29_vm0, %v28_v4, 0.0 }
   0xa   :  { %31 = vadd.xlane.f32.xlu0 %v30_v3 }
  0x12   :  { %34 = vadd.xlane.f32.xlu0 %v33_v5 }
  0x7d   :  { %v32_v6 = vpop.xlane.xlu0 %31 }
  0x7e   :  { %119 = vrsqrt.f32 %v32_v6  ;;  %vm43_vm1 = vcmp.eq.f32.partialorder %v32_v6, inf  ;;  %v46_v18 = vand.u32 2147483648, %v32_v6  ;;  %vm45_vm2 = vcmp.eq.f32.partialorder %v32_v6, 0.0 }
  0x84   :  { %v120_v7 = vpop.eup %119 }
  0x85   :  { %v37_v8 = vmul.f32 %v120_v7, %v32_v6  ;;  %v35_v9 = vpop.xlane.xlu0 %34 }
  0x86   :  { %121 = vrsqrt.f32 %v35_v9  ;;  %vm55_vm3 = vcmp.eq.f32.partialorder %v35_v9, inf  ;;  %v58_v27 = vand.u32 2147483648, %v35_v9  ;;  %vm57_vm4 = vcmp.eq.f32.partialorder %v35_v9, 0.0 }
  0x87   :  { %v38_v10 = vmul.f32 %v120_v7, %v37_v8 }
  0x89   :  { %v39_v11 = vmul.f32 0.5, %v38_v10 }
  0x8b   :  { %v40_v12 = vsub.f32 1.5, %v39_v11 }
  0x8c   :  { %v122_v13 = vpop.eup %121 }
  0x8d   :  { %v41_v14 = vmul.f32 %v120_v7, %v40_v12  ;;  %v49_v15 = vmul.f32 %v122_v13, %v35_v9 }
  0x8f   :  { %v42_v16 = vmul.f32 %v41_v14, %v32_v6  ;;  %v50_v17 = vmul.f32 %v122_v13, %v49_v15 }
  0x91   :  { %v44_v19 = vsel %vm43_vm1, %v32_v6, %v42_v16  ;;  %v51_v20 = vmul.f32 0.5, %v50_v17 }
  0x92   :  { %v47_v21 = vsel %vm45_vm2, %v46_v18, %v44_v19 }
  0x93   :  { %v60_v22 = vmul.f32 0.17677669, %v47_v21  ;;  %v52_v23 = vsub.f32 1.5, %v51_v20 }
  0x95   :  { %v62_v24 = vadd.f32 1e-06, %v60_v22  ;;  %v53_v25 = vmul.f32 %v122_v13, %v52_v23 }
  0x97   :  { %123 = vrcp.f32 %v62_v24  ;;  %v54_v26 = vmul.f32 %v53_v25, %v35_v9  ;;  %v75_v35 = vand.u32 2147483648, %v62_v24  ;;  %v73_v37 = vand.u32 2147483647, %v62_v24 }
  0x98   :  { %vm69_vm6 = vweird.f32 %v62_v24 }
  0x99   :  { %v56_v28 = vsel %vm55_vm3, %v35_v9, %v54_v26  ;;  %v76_v40 = vor.u32 1.1754944e-38, %v75_v35  ;;  %vm74_vm8 = vcmp.eq.f32.partialorder %v73_v37, 8.507059e+37 }
  0x9a   :  { %v59_v29 = vsel %vm57_vm4, %v58_v27, %v56_v28 }
  0x9b   :  { %v61_v30 = vmul.f32 0.17677669, %v59_v29 }
  0x9d   :  { %v124_v31 = vpop.eup %123  ;;  %v63_v32 = vadd.f32 1e-06, %v61_v30 }
  0x9e   :  { %v65_v33 = vmul.f32 %v124_v31, %v62_v24  ;;  %vm70_vm5 = vweird.f32 %v124_v31 }
  0x9f   :  { %125 = vrcp.f32 %v63_v32  ;;  %vm71_vm7 = vmor %vm69_vm6, %vm70_vm5  ;;  %v89_v46 = vand.u32 2147483648, %v63_v32  ;;  %v87_v48 = vand.u32 2147483647, %v63_v32  ;;  %vm83_vm10 = vweird.f32 %v63_v32 }
  0xa0   :  { %v66_v34 = vsub.f32 1.0, %v65_v33 }
  0xa1   :  { %v90_v50 = vor.u32 1.1754944e-38, %v89_v46  ;;  %vm88_vm12 = vcmp.eq.f32.partialorder %v87_v48, 8.507059e+37 }
  0xa2   :  { %v67_v36 = vmul.f32 %v124_v31, %v66_v34 }
  0xa4   :  { %v68_v38 = vadd.f32 %v124_v31, %v67_v36 }
  0xa5   :  { %v126_v39 = vpop.eup %125 }
  0xa6   :  { %v72_v41 = vsel %vm71_vm7, %v124_v31, %v68_v38  ;;  %v79_v42 = vmul.f32 %v126_v39, %v63_v32  ;;  %vm84_vm9 = vweird.f32 %v126_v39 }
  0xa7   :  { %v77_v43 = vsel %vm74_vm8, %v76_v40, %v72_v41  ;;  %vm85_vm11 = vmor %vm83_vm10, %vm84_vm9 }
  0xa8   :  { %v80_v44 = vsub.f32 1.0, %v79_v42  ;;  %v92_v45 = vmul.f32 %v77_v43, %v25_v0 }
  0xaa   :  { %v81_v47 = vmul.f32 %v126_v39, %v80_v44  ;;  %94 = vst.msk [vmem:[#allocation5] sm:$0xff] %vm29_vm0, %v92_v45 }
  0xac   :  { %v82_v49 = vadd.f32 %v126_v39, %v81_v47 }
  0xae   :  { %v86_v51 = vsel %vm85_vm11, %v126_v39, %v82_v49 }
  0xaf   :  { %v91_v52 = vsel %vm88_vm12, %v90_v50, %v86_v51 }
  0xb0   :  { %v93_v53 = vmul.f32 %v91_v52, %v199_v2 }
  0xb2   :  { %95 = vst.msk [vmem:[#allocation5 + $0x8] sm:$0xff] %vm29_vm0, %v93_v53 }
  0xb3   :  { %108 = dma.vmem_to_hbm [thread:$0]  %s101_s13, 256, %s103_s16, [#allocation4], %s180_s11, %s180_s11, %s181_s12  }
  0xb4   :  { %177 = dma.done.wait [#allocation4], 256  }
  0xb5   :  { %178 = vsyncadd [#allocation4], 4294967040 }
  0xb6   :  { %113 = vsyncpa [#allocation3], 1 }
  0xb7   :  { %114 = vsyncpa [#allocation4], 1 }

</bundles_post_ra>
